<compile_context>
chip_gen: v5e
topology: v5e:2x2
jax: 0.10.0
libtpu: 0.0.40
codegen_flags: <defaults>
</compile_context>

<pallas_src>
import functools
import math

import jax
import jax.numpy as jnp
from jax.experimental import pallas as pl
from jax.experimental.pallas import tpu as pltpu


def _round_up(n, m):
    return ((n + m - 1) // m) * m


def _maxout_kernel(x_ref, w_ref, b_ref, o_ref, *, n_channels, k_groups):
    """Fused linear + group-max (maxout) on one batch tile.

    x_ref : (TILE_B, J)        activation tile (streamed / pipelined)
    w_ref : (J, C*K)           packed weight slab, column index = c*K + g
    b_ref : (1, C*K)           packed bias row, same column order
    o_ref : (TILE_B, K)        maxout output tile
    """
    # Single MXU pass for all channels at once, f32 accumulation.
    y = jnp.dot(x_ref[...], w_ref[...], preferred_element_type=jnp.float32)
    y = y + b_ref[...]                      # broadcast (1, C*K) over rows

    # Maxout: max over the C channel slabs (static lane slices -> VPU max).
    out = y[:, 0:k_groups]
    for c in range(1, n_channels):
        out = jnp.maximum(out, y[:, c * k_groups:(c + 1) * k_groups])

    o_ref[...] = out.astype(o_ref.dtype)


def pack_maxout_params(weights, bias, *, j_inputs, k_output_groups, n_channels):
    """One-time repack of PyTorch-layout params (do NOT call per forward).

    weights: (C*K, J) with row m = g*C + c   ->   w_all: (J, C*K), col = c*K + g
    bias:    (C*K,)                          ->   b_all: (1, C*K), col = c*K + g
    """
    K, C, J = k_output_groups, n_channels, j_inputs
    w = weights.reshape(K, C, J)                              # [g, c, j]
    w_all = jnp.transpose(w, (2, 1, 0)).reshape(J, C * K)     # [j, c*K + g]
    b_all = bias.reshape(K, C).T.reshape(1, C * K)            # [1, c*K + g]
    return w_all, b_all


def custom_maxout(x, w_all, b_all, *, k_output_groups, n_channels, tile_b=None):
    """Forward pass: x (B, J) -> (B, K) maxout, using pre-packed params."""
    B, J = x.shape
    K, C = k_output_groups, n_channels
    CK = C * K
    assert w_all.shape == (J, CK), w_all.shape
    assert b_all.shape == (1, CK), b_all.shape

    if tile_b is None:
        # Large batch tiles amortize the ~0.35us/step grid overhead; an x row
        # is only J*4 bytes so even 1024 rows is a tiny VMEM block (safe under
        # v7x's 64 MiB VMEM with double buffering).
        tile_b = min(1024, _round_up(B, 8))

    # Pad batch so every grid step gets a full (tile_b, J) block.
    B_pad = _round_up(B, tile_b)
    x_in = x
    if B_pad != B:
        x_in = jnp.pad(x, ((0, B_pad - B), (0, 0)))

    grid = (B_pad // tile_b,)
    kernel = functools.partial(_maxout_kernel, n_channels=C, k_groups=K)

    out = pl.pallas_call(
        kernel,
        out_shape=jax.ShapeDtypeStruct((B_pad, K), x.dtype),
        grid=grid,
        in_specs=[
            pl.BlockSpec((tile_b, J), lambda i: (i, 0)),   # x: tiled over batch
            pl.BlockSpec((J, CK), lambda i: (0, 0)),       # weights: VMEM-resident
            pl.BlockSpec((1, CK), lambda i: (0, 0)),       # bias: VMEM-resident
        ],
        out_specs=pl.BlockSpec((tile_b, K), lambda i: (i, 0)),
        compiler_params=pltpu.CompilerParams(
            dimension_semantics=("parallel",)),            # shards across v7x TCs
    )(x_in, w_all, b_all)

    if B_pad != B:
        out = out[:B]
    return out


def _reference(x, weights, bias, k_output_groups, n_channels):
    """Pure-JAX reference: linear -> group max over consecutive C outputs."""
    y = x @ weights.T + bias
    B = x.shape[0]
    return jnp.max(y.reshape(B, k_output_groups, n_channels), axis=-1)


if __name__ == "__main__":
    # Module hyperparameters (small, consistent with the forward pass).
    J_INPUTS = 32          # j_inputs
    K_GROUPS = 8           # k_output_groups
    N_CHANNELS = 4         # n_channels (maxout pool size)
    BATCH = 2

    key = jax.random.PRNGKey(0)
    k_w, k_b, k_x, k_x2 = jax.random.split(key, 4)

    # Deterministic init matching nn.init.uniform_(-1/sqrt(J), 1/sqrt(J)).
    lim = 1.0 / math.sqrt(J_INPUTS)
    weights = jax.random.uniform(
        k_w, (N_CHANNELS * K_GROUPS, J_INPUTS), jnp.float32, -lim, lim)
    bias = jax.random.uniform(
        k_b, (N_CHANNELS * K_GROUPS,), jnp.float32, -lim, lim)

    # One-time parameter packing (outside the per-call path).
    w_all, b_all = pack_maxout_params(
        weights, bias,
        j_inputs=J_INPUTS, k_output_groups=K_GROUPS, n_channels=N_CHANNELS)

    # --- tiny batch (matches the module's toy sizes) -----------------------
    x = jax.random.normal(k_x, (BATCH, J_INPUTS), jnp.float32)
    out = custom_maxout(
        x, w_all, b_all, k_output_groups=K_GROUPS, n_channels=N_CHANNELS)
    out = jax.block_until_ready(out)
    ref = _reference(x, weights, bias, K_GROUPS, N_CHANNELS)
    assert out.shape == (BATCH, K_GROUPS), out.shape
    assert jnp.allclose(out, ref, atol=1e-5, rtol=1e-5), "kernel/ref mismatch"

    # --- larger batch to exercise the batch grid / pipelining --------------
    B2 = 256
    x2 = jax.random.normal(k_x2, (B2, J_INPUTS), jnp.float32)
    out2 = custom_maxout(
        x2, w_all, b_all, k_output_groups=K_GROUPS, n_channels=N_CHANNELS,
        tile_b=64)  # force multiple grid steps
    out2 = jax.block_until_ready(out2)
    ref2 = _reference(x2, weights, bias, K_GROUPS, N_CHANNELS)
    assert out2.shape == (B2, K_GROUPS), out2.shape
    assert jnp.allclose(out2, ref2, atol=1e-5, rtol=1e-5), "tiled kernel/ref mismatch"

    print("KERNEL_OK")
</pallas_src>

<mosaic_0001>
module attributes {stable_mosaic.version = 11 : i64} {
  func.func @_maxout_kernel(%arg0: i32, %arg1: memref<8x32xf32, #tpu.memory_space<vmem>>, %arg2: memref<32x32xf32, #tpu.memory_space<vmem>>, %arg3: memref<1x32xf32, #tpu.memory_space<vmem>>, %arg4: memref<8x8xf32, #tpu.memory_space<vmem>>) attributes {dimension_semantics = [#tpu.dimension_semantics<parallel>], iteration_bounds = array<i64: 1>, scalar_prefetch = 0 : i64, scratch_operands = 0 : i64, tpu.core_type = #tpu.core_type<tc>, window_params = [{transform_indices = @transform_0, window_bounds = array<i64: 8, 32>}, {pipeline_mode = #tpu.pipeline_mode<synchronous>, transform_indices = @transform_1, window_bounds = array<i64: 32, 32>}, {pipeline_mode = #tpu.pipeline_mode<synchronous>, transform_indices = @transform_2, window_bounds = array<i64: 1, 32>}, {transform_indices = @transform_3, window_bounds = array<i64: 8, 8>}]} {
    %c0 = arith.constant 0 : index
    %c0_0 = arith.constant 0 : index
    %0 = vector.load %arg1[%c0, %c0_0] : memref<8x32xf32, #tpu.memory_space<vmem>>, vector<8x32xf32>
    %c0_1 = arith.constant 0 : index
    %c0_2 = arith.constant 0 : index
    %1 = vector.load %arg2[%c0_1, %c0_2] : memref<32x32xf32, #tpu.memory_space<vmem>>, vector<32x32xf32>
    %cst = arith.constant dense<0.000000e+00> : vector<8x32xf32>
    %2 = tpu.matmul %0, %1, %cst {dimension_numbers = #tpu.dot_dimension_numbers<[1], [0], [0], [1], [0, 0, 1, 1], [], []>} : vector<8x32xf32>, vector<32x32xf32>, vector<8x32xf32> -> vector<8x32xf32>
    %c0_3 = arith.constant 0 : index
    %c0_4 = arith.constant 0 : index
    %3 = vector.load %arg3[%c0_3, %c0_4] : memref<1x32xf32, #tpu.memory_space<vmem>>, vector<1x32xf32>
    %4 = vector.broadcast %3 : vector<1x32xf32> to vector<8x32xf32>
    %5 = arith.addf %2, %4 : vector<8x32xf32>
    %6 = vector.extract_strided_slice %5 {offsets = [0, 0], sizes = [8, 8], strides = [1, 1]} : vector<8x32xf32> to vector<8x8xf32>
    %7 = vector.extract_strided_slice %5 {offsets = [0, 8], sizes = [8, 8], strides = [1, 1]} : vector<8x32xf32> to vector<8x8xf32>
    %8 = arith.maximumf %6, %7 : vector<8x8xf32>
    %9 = vector.extract_strided_slice %5 {offsets = [0, 16], sizes = [8, 8], strides = [1, 1]} : vector<8x32xf32> to vector<8x8xf32>
    %10 = arith.maximumf %8, %9 : vector<8x8xf32>
    %11 = vector.extract_strided_slice %5 {offsets = [0, 24], sizes = [8, 8], strides = [1, 1]} : vector<8x32xf32> to vector<8x8xf32>
    %12 = arith.maximumf %10, %11 : vector<8x8xf32>
    %c0_5 = arith.constant 0 : index
    %c0_6 = arith.constant 0 : index
    %13 = vector.load %arg4[%c0_5, %c0_6] : memref<8x8xf32, #tpu.memory_space<vmem>>, vector<8x8xf32>
    tpu.vector_store %arg4[%c0_5, %c0_6], %12 {strides = array<i32>} : memref<8x8xf32, #tpu.memory_space<vmem>>, vector<8x8xf32>,
    return
  }
  func.func @transform_0(%arg0: i32) -> (i32, i32) {
    %c0_i32 = arith.constant 0 : i32
    %c0_i32_0 = arith.constant 0 : i32
    return %arg0, %c0_i32 : i32, i32
  }
  func.func @transform_1(%arg0: i32) -> (i32, i32) {
    %c0_i32 = arith.constant 0 : i32
    %c0_i32_0 = arith.constant 0 : i32
    %c0_i32_1 = arith.constant 0 : i32
    return %c0_i32, %c0_i32_0 : i32, i32
  }
  func.func @transform_2(%arg0: i32) -> (i32, i32) {
    %c0_i32 = arith.constant 0 : i32
    %c0_i32_0 = arith.constant 0 : i32
    %c0_i32_1 = arith.constant 0 : i32
    return %c0_i32, %c0_i32_0 : i32, i32
  }
  func.func @transform_3(%arg0: i32) -> (i32, i32) {
    %c0_i32 = arith.constant 0 : i32
    %c0_i32_0 = arith.constant 0 : i32
    return %arg0, %c0_i32 : i32, i32
  }
}

</mosaic_0001>

<bundles_post_ra>
// kernel: tpu_custom_call.1
= control target key start
LH: loop header
LB: loop body
LE: loop exit
PB: predicated region body
PF: predicated region fallthrough
CT: control target
= control target key end

     0   :  { %8 = vsyncpa [#allocation3], 0  ;;  %s239_s0 = inlined_call_operand.hbm [shape: f32[8,32], index: 0, kind: input, shape index: {}]   ;;  %s240_s1 = inlined_call_operand.hbm [shape: f32[32,32], index: 1, kind: input, shape index: {}]   ;;  %s241_s2 = inlined_call_operand.vmem [shape: f32[1,32], index: 2, kind: input, shape index: {}]   ;;  %s242_s3 = inlined_call_operand.hbm [shape: f32[8,8], index: 3, kind: output, shape index: {}]  }
   0x1   :  { %9 = vsyncpa [#allocation6], 0 }
   0x2   :  { %10 = vsyncpa [#allocation4], 0  ;;  %s16_s14 = sshll.u32 %s239_s0, 4  ;;  %s199_s15 = smov [#allocation2]   ;;  %s17_s14 = int_to_ptr.hbm [resolvable:$true] %s16_s14 }
   0x3   :  { %s18_s16 = sshll.u32 %s199_s15, 4  ;;  %s26_s19 = sshll.u32 %s240_s1, 4  ;;  %s19_s16 = int_to_ptr.vmem [resolvable:$true] %s18_s16  ;;  %s27_s19 = int_to_ptr.hbm [resolvable:$true] %s26_s19 }
   0x4   :  { %21 = dma.hbm_to_vmem [thread:$0]  %s17_s14, 128, %s19_s16, [#allocation3]  }
   0x5   :  { %s200_s20 = smov [#allocation5]   ;;  %s201_s22 = smov 128  }
   0x6   :  { %s28_s21 = sshll.u32 %s200_s20, 4  ;;  %s202_s23 = smov 8   ;;  %s29_s21 = int_to_ptr.vmem [resolvable:$true] %s28_s21 }
   0x7   :  { %34 = dma.hbm_to_vmem [thread:$0]  %s27_s19, 512, %s29_s21, [#allocation6], %s201_s22, %s201_s22, %s202_s23  }
   0x8   :  { %193 = dma.done.wait [#allocation3], 128  }
   0x9   :  { %194 = vsyncadd [#allocation3], 4294967168 }
   0xa   :  { %195 = dma.done.wait [#allocation6], 512  }
   0xb   :  { %196 = vsyncadd [#allocation6], 4294966784  ;;  %v49_v0 = vld [vmem:[#allocation5 + $0x18] sm:$0xff]  ;;  %v48_v1 = vld [vmem:[#allocation5 + $0x10] sm:$0xff]  ;;  %vm54_vm0 = vcmask 261120   ;;  %s203_s24 = smov 104  }
   0xc   :  { %70 = vmatpush.msra.mxu0 %v49_v0  ;;  %v47_v2 = vld [vmem:[#allocation5 + $0x8] sm:$0xff]  ;;  %v46_v3 = vld [vmem:[#allocation5] sm:$0xff]  ;;  %v45_v4 = vld [vmem:[#allocation2] sm:$0xff]  ;;  %s204_s25 = smov 120   ;;  %s205_s26 = smov 112   ;;  %vm91_vm1 = vcmask 64512  }
   0xd   :  { %v120_v5 = vld [vmem:[%s241_s2] ss:$0 sm:$0xff]  ;;  %s206_s27 = smov [#allocation7]   ;;  %s100_s4 = sshll.u32 %s242_s3, 4  ;;  %s101_s4 = int_to_ptr.hbm [resolvable:$true] %s100_s4 }
   0xe   :  { %71 = vmatpush.msra.mxu0 %v48_v1  ;;  %s98_s28 = sshll.u32 %s206_s27, 4  ;;  %s99_s28 = int_to_ptr.vmem [resolvable:$true] %s98_s28 }
  0x10   :  { %72 = vmatpush.msra.mxu0 %v47_v2 }
  0x12   :  { %73 = vmatpush.msra.mxu0 %v46_v3 }
  0x13   :  { %111 = vmatmul.msk.f32.vlgmr.msra.gmra.mxu0 %vm54_vm0, %v45_v4 }
  0x90   :  { %v75_v6 = vpop.f32.mrf.mxu0 }
  0x91   :  { %v76_v7 = vadd.f32 %v120_v5, %v75_v6 }
  0x93   :  { %87 = vrot.lane.b32.xlu1 %v76_v7, %s203_s24  ;;  %79 = vrot.lane.b32.xlu0 %v76_v7, %s204_s25 }
  0x9b   :  { %83 = vrot.lane.b32.xlu0 %v76_v7, %s205_s26 }
 0x105   :  { %v80_v8 = vpop.permute.xlu0 %79  ;;  %v88_v12 = vpop.permute.xlu1 %87 }
 0x106   :  { %v82_v9 = vmax.f32 %v76_v7, %v80_v8 }
 0x10d   :  { %v84_v10 = vpop.permute.xlu0 %83 }
 0x10e   :  { %v86_v11 = vmax.f32 %v82_v9, %v84_v10 }
 0x110   :  { %v90_v13 = vmax.f32 %v86_v11, %v88_v12 }
 0x112   :  { %92 = vst.msk [vmem:[#allocation7] sm:$0xff] %vm91_vm1, %v90_v13 }
 0x113   :  { %103 = dma.vmem_to_hbm [thread:$0]  %s99_s28, 128, %s101_s4, [#allocation4]  }
 0x114   :  { %197 = dma.done.wait [#allocation4], 128  }
 0x115   :  { %198 = vsyncadd [#allocation4], 4294967168 }
 0x116   :  { %108 = vsyncpa [#allocation3], 1 }
 0x117   :  { %109 = vsyncpa [#allocation6], 1 }
 0x118   :  { %110 = vsyncpa [#allocation4], 1 }

</bundles_post_ra>
